<compile_context>
chip_gen: v7x
topology: tpu7x:2x2x1
jax: 0.10.0
libtpu: 0.0.40
codegen_flags: <defaults>
</compile_context>

<pallas_src>
import math

import jax
import jax.numpy as jnp
from jax.experimental import pallas as pl
from jax.experimental.pallas import tpu as pltpu


def _round_up(x, m):
    return ((x + m - 1) // m) * m


def _mlp_kernel(x_ref, p_ref, o_ref):
    """Fused MLP forward for one batch tile.

    x_ref : (TB, d_in)     activations, batch on sublanes, features on lanes
    p_ref : (L, D+1, D)    packed parameter slab (weights zero-padded; bias in
                           row D; last layer's (d,1) weight stored transposed
                           in row 0, its bias at [D, 0])
    o_ref : (1, 1, TB)     sigmoid output, batch on the lane axis (lane-dense)
    """
    n_layers = p_ref.shape[0]
    d_pad = p_ref.shape[2]

    h = x_ref[...].astype(jnp.float32)                       # (TB, d_in)

    # Hidden stack: Linear + ReLU on the MXU.  Weights are zero-padded to d_pad
    # lanes/rows, so padded columns of h remain exactly 0 after bias + ReLU.
    for layer in range(n_layers - 1):
        p_l = p_ref[layer]                                   # (d_pad + 1, d_pad)
        k = h.shape[1]                                       # contraction width
        w = p_l[0:k, :]                                      # (k, d_pad)
        b = p_l[d_pad:d_pad + 1, :]                          # (1, d_pad)
        h = jnp.dot(h, w, preferred_element_type=jnp.float32) + b
        h = jnp.maximum(h, 0.0)                              # (TB, d_pad)

    # Final Linear(d, 1) + Sigmoid without a degenerate N=1 MXU matmul:
    #   VPU multiply by the transposed weight row, XLU transpose of the
    #   tile-aligned product, XLU sublane reduction -> lane-dense (1, TB) row.
    p_last = p_ref[n_layers - 1]
    w_row = p_last[0:1, :]                                   # (1, d_pad) = W_last^T
    b_last = p_last[d_pad:d_pad + 1, 0:1]                    # (1, 1)
    prod = h * w_row                                         # (TB, d_pad)   VPU
    z = jnp.sum(jnp.transpose(prod), axis=0, keepdims=True)  # (1, TB)       XLU
    o_ref[0] = jax.nn.sigmoid(z + b_last).astype(o_ref.dtype)  # EUP + store


def _pack_params(weights, biases, d_pad):
    """Pack all layer parameters into one zero-padded f32 slab (single DMA)."""
    n_layers = len(weights)
    slab = jnp.zeros((n_layers, d_pad + 1, d_pad), jnp.float32)
    for l, (w, b) in enumerate(zip(weights, biases)):
        if l < n_layers - 1:
            slab = slab.at[l, : w.shape[0], : w.shape[1]].set(w.astype(jnp.float32))
            slab = slab.at[l, d_pad, : b.shape[0]].set(b.astype(jnp.float32))
        else:
            # Final (d, 1) layer: store W^T as row 0, bias scalar at (d_pad, 0).
            slab = slab.at[l, 0, : w.shape[0]].set(w[:, 0].astype(jnp.float32))
            slab = slab.at[l, d_pad, 0].set(b[0].astype(jnp.float32))
    return slab


def mlp_forward(x, weights, biases, *, batch_tile=512):
    """sigmoid(ReLU(...ReLU(x @ W1 + b1)...) @ W_last + b_last), returns (B, 1)."""
    B, d_in = x.shape
    n_layers = len(weights)
    assert n_layers >= 2, "model has at least input_to_hidden and last_layer"

    all_dims = [d_in] + [w.shape[0] for w in weights] + [w.shape[1] for w in weights]
    d_pad = _round_up(max(all_dims), 128)                    # lane-dense slab width
    params = _pack_params(weights, biases, d_pad)

    # Batch tiling: single grid-less call at small batch; otherwise tile with
    # TB = batch_tile (multiple of 256 for full MXU row passes on v6e/v7x).
    b8 = _round_up(max(B, 8), 8)
    if b8 <= batch_tile:
        tb, n_tiles = b8, 1
    else:
        tb = batch_tile
        n_tiles = pl.cdiv(B, tb)
    b_pad = n_tiles * tb
    if b_pad != B:
        x = jnp.pad(x, ((0, b_pad - B), (0, 0)))
    x = x.astype(jnp.float32)

    out_shape = jax.ShapeDtypeStruct((n_tiles, 1, tb), jnp.float32)

    if n_tiles == 1:
        # Whole-array VMEM refs, no grid -> no pipeline prologue/epilogue,
        # exactly two HBM->VMEM transfers (x and the packed slab).
        out = pl.pallas_call(_mlp_kernel, out_shape=out_shape)(x, params)
    else:
        # Realistic batch: batch axis tiled and marked "parallel" (2 TCs on v7x);
        # the slab's block index is constant so it stays VMEM-resident while x
        # tiles stream through the double-buffered pipeline.
        out = pl.pallas_call(
            _mlp_kernel,
            grid=(n_tiles,),
            in_specs=[
                pl.BlockSpec((tb, d_in), lambda i: (i, 0)),
                pl.BlockSpec(params.shape, lambda i: (0, 0, 0)),
            ],
            out_specs=pl.BlockSpec((1, 1, tb), lambda i: (i, 0, 0)),
            out_shape=out_shape,
            compiler_params=pltpu.CompilerParams(
                dimension_semantics=("parallel",)),
        )(x, params)

    return out.reshape(-1)[:B].reshape(B, 1)


def init_params(key, input_dim, hidden_dim):
    """PyTorch-style (Kaiming-uniform) Linear init; weights stored as (in, out)."""
    dims = [input_dim] + list(hidden_dim) + [1]
    weights, biases = [], []
    for i in range(len(dims) - 1):
        fan_in, fan_out = dims[i], dims[i + 1]
        bound = 1.0 / math.sqrt(fan_in)
        key, kw, kb = jax.random.split(key, 3)
        weights.append(jax.random.uniform(kw, (fan_in, fan_out), jnp.float32, -bound, bound))
        biases.append(jax.random.uniform(kb, (fan_out,), jnp.float32, -bound, bound))
    return weights, biases


def reference_forward(x, weights, biases):
    h = x
    n = len(weights)
    for i, (w, b) in enumerate(zip(weights, biases)):
        h = h @ w + b
        h = jnp.maximum(h, 0.0) if i < n - 1 else jax.nn.sigmoid(h)
    return h


if __name__ == "__main__":
    # Shapes consistent with nn_model(input_dim=32, hidden_dim=[32, 16], lr=...)
    batch = 8
    input_dim = 32
    hidden_dim = [32, 16]

    key = jax.random.PRNGKey(0)
    key, kx = jax.random.split(key)
    x = jax.random.normal(kx, (batch, input_dim), jnp.float32)
    weights, biases = init_params(key, input_dim, hidden_dim)

    out = jax.block_until_ready(mlp_forward(x, weights, biases))
    ref = reference_forward(x, weights, biases)

    assert out.shape == (batch, 1)
    # Tolerance covers TPU default (reduced-precision) MXU passes that the XLA
    # reference path may use for f32 matmuls; the kernel's final layer is exact
    # f32 VPU math.
    assert jnp.allclose(out, ref, atol=2e-3, rtol=2e-3), float(jnp.max(jnp.abs(out - ref)))
    print("KERNEL_OK")
</pallas_src>

<mosaic_0001>
module attributes {stable_mosaic.version = 11 : i64} {
  func.func @_mlp_kernel(%arg0: memref<8x32xf32, #tpu.memory_space<vmem>>, %arg1: memref<3x129x128xf32, #tpu.memory_space<vmem>>, %arg2: memref<1x1x8xf32, #tpu.memory_space<vmem>>) attributes {dimension_semantics = [], scalar_prefetch = 0 : i64, scratch_operands = 0 : i64, tpu.core_type = #tpu.core_type<tc>} {
    %c0 = arith.constant 0 : index
    %c0_0 = arith.constant 0 : index
    %0 = vector.load %arg0[%c0, %c0_0] : memref<8x32xf32, #tpu.memory_space<vmem>>, vector<8x32xf32>
    %c0_1 = arith.constant 0 : index
    %c0_2 = arith.constant 0 : index
    %c0_3 = arith.constant 0 : index
    %1 = vector.load %arg1[%c0_1, %c0_2, %c0_3] : memref<3x129x128xf32, #tpu.memory_space<vmem>>, vector<1x129x128xf32>
    %2 = vector.shape_cast %1 : vector<1x129x128xf32> to vector<129x128xf32>
    %3 = vector.extract_strided_slice %2 {offsets = [0, 0], sizes = [32, 128], strides = [1, 1]} : vector<129x128xf32> to vector<32x128xf32>
    %4 = vector.extract_strided_slice %2 {offsets = [128, 0], sizes = [1, 128], strides = [1, 1]} : vector<129x128xf32> to vector<1x128xf32>
    %cst = arith.constant dense<0.000000e+00> : vector<8x128xf32>
    %5 = tpu.matmul %0, %3, %cst {dimension_numbers = #tpu.dot_dimension_numbers<[1], [0], [0], [1], [0, 0, 1, 1], [], []>} : vector<8x32xf32>, vector<32x128xf32>, vector<8x128xf32> -> vector<8x128xf32>
    %6 = vector.broadcast %4 : vector<1x128xf32> to vector<8x128xf32>
    %7 = arith.addf %5, %6 : vector<8x128xf32>
    %cst_4 = arith.constant 0.000000e+00 : f32
    %8 = vector.broadcast %cst_4 : f32 to vector<8x128xf32>
    %9 = arith.maximumf %7, %8 : vector<8x128xf32>
    %c1 = arith.constant 1 : index
    %c0_5 = arith.constant 0 : index
    %c0_6 = arith.constant 0 : index
    %10 = vector.load %arg1[%c1, %c0_5, %c0_6] : memref<3x129x128xf32, #tpu.memory_space<vmem>>, vector<1x129x128xf32>
    %11 = vector.shape_cast %10 : vector<1x129x128xf32> to vector<129x128xf32>
    %12 = vector.extract_strided_slice %11 {offsets = [0, 0], sizes = [128, 128], strides = [1, 1]} : vector<129x128xf32> to vector<128x128xf32>
    %13 = vector.extract_strided_slice %11 {offsets = [128, 0], sizes = [1, 128], strides = [1, 1]} : vector<129x128xf32> to vector<1x128xf32>
    %cst_7 = arith.constant dense<0.000000e+00> : vector<8x128xf32>
    %14 = tpu.matmul %9, %12, %cst_7 {dimension_numbers = #tpu.dot_dimension_numbers<[1], [0], [0], [1], [0, 0, 1, 1], [], []>} : vector<8x128xf32>, vector<128x128xf32>, vector<8x128xf32> -> vector<8x128xf32>
    %15 = vector.broadcast %13 : vector<1x128xf32> to vector<8x128xf32>
    %16 = arith.addf %14, %15 : vector<8x128xf32>
    %cst_8 = arith.constant 0.000000e+00 : f32
    %17 = vector.broadcast %cst_8 : f32 to vector<8x128xf32>
    %18 = arith.maximumf %16, %17 : vector<8x128xf32>
    %c2 = arith.constant 2 : index
    %c0_9 = arith.constant 0 : index
    %c0_10 = arith.constant 0 : index
    %19 = vector.load %arg1[%c2, %c0_9, %c0_10] : memref<3x129x128xf32, #tpu.memory_space<vmem>>, vector<1x129x128xf32>
    %20 = vector.shape_cast %19 : vector<1x129x128xf32> to vector<129x128xf32>
    %21 = vector.extract_strided_slice %20 {offsets = [0, 0], sizes = [1, 128], strides = [1, 1]} : vector<129x128xf32> to vector<1x128xf32>
    %22 = vector.extract_strided_slice %20 {offsets = [128, 0], sizes = [1, 1], strides = [1, 1]} : vector<129x128xf32> to vector<1x1xf32>
    %23 = vector.broadcast %21 : vector<1x128xf32> to vector<8x128xf32>
    %24 = arith.mulf %18, %23 : vector<8x128xf32>
    %25 = tpu.transpose %24, [1, 0] : vector<8x128xf32> -> vector<128x8xf32>
    %cst_11 = arith.constant dense<0.000000e+00> : vector<8xf32>
    %26 = vector.multi_reduction <add>, %25, %cst_11 [0] : vector<128x8xf32> to vector<8xf32>
    %27 = vector.shape_cast %26 : vector<8xf32> to vector<1x8xf32>
    %28 = vector.broadcast %22 : vector<1x1xf32> to vector<1x8xf32>
    %29 = arith.addf %27, %28 : vector<1x8xf32>
    %30 = arith.negf %29 : vector<1x8xf32>
    %31 = math.exp %30 : vector<1x8xf32>
    %cst_12 = arith.constant 1.000000e+00 : f32
    %32 = vector.broadcast %cst_12 : f32 to vector<1x8xf32>
    %33 = arith.addf %32, %31 : vector<1x8xf32>
    %34 = arith.divf %32, %33 : vector<1x8xf32>
    %c0_13 = arith.constant 0 : index
    %c0_14 = arith.constant 0 : index
    %c0_15 = arith.constant 0 : index
    %35 = vector.load %arg2[%c0_13, %c0_14, %c0_15] : memref<1x1x8xf32, #tpu.memory_space<vmem>>, vector<1x1x8xf32>
    %36 = vector.shape_cast %35 : vector<1x1x8xf32> to vector<1x8xf32>
    %37 = vector.shape_cast %34 : vector<1x8xf32> to vector<1x1x8xf32>
    tpu.vector_store %arg2[%c0_13, %c0_14, %c0_15], %37 {strides = array<i32>} : memref<1x1x8xf32, #tpu.memory_space<vmem>>, vector<1x1x8xf32>,
    return
  }
}

</mosaic_0001>

<bundles_post_ra>
// kernel: tpu_custom_call.1
= control target key start
LH: loop header
LB: loop body
LE: loop exit
PB: predicated region body
PF: predicated region fallthrough
CT: control target
= control target key end

     0   :  { %7 = vsyncpa [#allocation3], 0  ;;  %s595_s0 = inlined_call_operand.hbm [shape: f32[8,32], index: 0, kind: input, shape index: {}]   ;;  %s596_s1 = inlined_call_operand.hbm [shape: f32[3,129,128], index: 1, kind: input, shape index: {}]   ;;  %s597_s2 = inlined_call_operand.hbm [shape: f32[1,1,8], index: 2, kind: output, shape index: {}]  }
   0x1   :  { %8 = vsyncpa [#allocation6], 0 }
   0x2   :  { %9 = vsyncpa [#allocation4], 0  ;;  %s512_s9 = smov [#allocation2]   ;;  %s513_s11 = smov [#allocation5]  }
   0x3   :  { %s16_s10 = sshll.u32 %s512_s9, 4  ;;  %s25_s12 = sshll.u32 %s513_s11, 4  ;;  %s17_s10 = int_to_ptr.vmem [resolvable:$true] %s16_s10  ;;  %s536_s12 = int_to_ptr.vmem [resolvable:$true] %s25_s12 }
   0x4   :  { %s440_s15 = scalar_lea.hbm %s595_s0, 128 }
   0x5   :  { %p441_p0 = scmp.ne.s32.totalorder %s595_s0, %s440_s15  ;;  %p444_p1 = scmp.lt.u32.totalorder %s440_s15, %s595_s0 }
   0x7   :  { %p446_p2 = pnand %p444_p1, %p441_p0 }
   0x9   :  { %449 = shalt.err (!%p446_p2)
}
   0xa   :  { %s450_s20 = scalar_lea.vmem %s17_s10, 128  ;;  %p455_p4 = scmp.lt.s32.totalorder %s17_s10, %s17_s10 }
   0xb   :  { %p451_p3 = scmp.ne.s32.totalorder %s17_s10, %s450_s20  ;;  %p456_p5 = scmp.lt.s32.totalorder %s450_s20, %s450_s20 }
   0xd   :  { %p457_p6 = por %p456_p5, %p455_p4 }
   0xf   :  { %p458_p7 = pnand %p457_p6, %p451_p3 }
  0x11   :  { %461 = shalt.err (!%p458_p7)
}
  0x12   :  { %19 = dma.hbm_to_vmem [thread:$0]  %s595_s0, 128, %s17_s10, [#allocation3]  }
  0x13   :  { %s462_s25 = scalar_lea.hbm %s596_s1, 6528 }
  0x14   :  { %p463_p8 = scmp.ne.s32.totalorder %s596_s1, %s462_s25  ;;  %p466_p9 = scmp.lt.u32.totalorder %s462_s25, %s596_s1 }
  0x16   :  { %p468_p10 = pnand %p466_p9, %p463_p8 }
  0x18   :  { %471 = shalt.err (!%p468_p10)
}
  0x19   :  { %s472_s30 = scalar_lea.vmem %s536_s12, 6528  ;;  %p477_p12 = scmp.lt.s32.totalorder %s536_s12, %s536_s12 }
  0x1a   :  { %p473_p11 = scmp.ne.s32.totalorder %s536_s12, %s472_s30  ;;  %p478_p13 = scmp.lt.s32.totalorder %s472_s30, %s472_s30 }
  0x1c   :  { %p479_p0 = por %p478_p13, %p477_p12 }
  0x1e   :  { %p480_p1 = pnand %p479_p0, %p473_p11 }
  0x20   :  { %483 = shalt.err (!%p480_p1)
}
  0x21   :  { %s514_s0 = smov 128   ;;  %s515_s3 = smov 8  }
  0x22   :  { %31 = dma.hbm_to_vmem [thread:$0]  %s596_s1, 6528, %s536_s12, [#allocation6], %s514_s0, %s514_s0, %s515_s3  }
  0x23   :  { %506 = dma.done.wait [#allocation3], 128  }
  0x24   :  { %507 = vsyncadd [#allocation3], 4294967168 }
  0x25   :  { %508 = dma.done.wait [#allocation6], 6528  }
  0x26   :  { %509 = vsyncadd [#allocation6], 4294960768  ;;  %v516_v0 = vmov 0.0|0.0   ;;  %vm517_vm0 = vmmov 0   ;;  %v518_v1 = vmov 0.0   ;;  %v39_v2 = vld [vmem:[#allocation5] sm:$0xff]  ;;  %v219_v38 = vlaneseq }
  0x27   :  { %396 = vmatprep.subr.bf16.mxu0 %v516_v0  ;;  %358 = vmatprep.mubr.msk.f32.mxu0 %vm517_vm0, %v518_v1  ;;  %v40_v3 = vld [vmem:[#allocation5 + $0x8] sm:$0xff]  ;;  %v41_v4 = vld [vmem:[#allocation5 + $0x10] sm:$0xff]  ;;  %v42_v6 = vld [vmem:[#allocation5 + $0x18] sm:$0xff]  ;;  %vm48_vm1 = vcmask 261120   ;;  %v519_v49 = vmov 0   ;;  %vm256_vm2 = vcmask 64512  }
  0x28   :  { %402 = vmatprep.subr.bf16.mxu1 %v516_v0  ;;  %393 = vmatprep.mubr.msk.f32.mxu1 %vm517_vm0, %v518_v1  ;;  %v397_v5 = vpack.c.bf16 %v40_v3, %v39_v2  ;;  %v124_v7 = vld [vmem:[#allocation5 + $0x88] sm:$0xff]  ;;  %v125_v8 = vld [vmem:[#allocation5 + $0x90] sm:$0xff]  ;;  %v126_v9 = vld [vmem:[#allocation5 + $0x98] sm:$0xff]  ;;  %v400_v11 = vpack.c.bf16 %v42_v6, %v41_v4  ;;  %v220_v39 = vshrl.u32 %v219_v38, 7  ;;  %s520_s1 = smov [#allocation7]   ;;  %vm306_vm3 = vcmask 57344  }
  0x29   :  { %v127_v10 = vld [vmem:[#allocation5 + $0xa0] sm:$0xff]  ;;  %v403_v12 = vpack.c.bf16 %v125_v8, %v124_v7  ;;  %v128_v14 = vld [vmem:[#allocation5 + $0xa8] sm:$0xff]  ;;  %v129_v15 = vld [vmem:[#allocation5 + $0xb0] sm:$0xff]  ;;  %s314_s6 = sshll.u32 %s520_s1, 4  ;;  %s315_s6 = int_to_ptr.vmem [resolvable:$true] %s314_s6 }
  0x2a   :  { %398 = vmatpush3.bf16.msra.mxu0 %v397_v5  ;;  %v406_v13 = vpack.c.bf16 %v127_v10, %v126_v9  ;;  %v38_v16 = vld [vmem:[#allocation2] sm:$0xff]  ;;  %v409_v17 = vpack.c.bf16 %v129_v15, %v128_v14  ;;  %v131_v19 = vld [vmem:[#allocation5 + $0xc0] sm:$0xff]  ;;  %v132_v21 = vld [vmem:[#allocation5 + $0xc8] sm:$0xff]  ;;  %v221_v40 = vsub.s32 0, %v220_v39  ;;  %s484_s7 = scalar_lea.vmem %s315_s6, 16  ;;  %s488_s8 = scalar_lea.vmem %s315_s6, 32 }
  0x2b   :  { %399 = vmatprep.subr.bf16.mxu0 %v516_v0  ;;  %404 = vmatpush3.bf16.msra.mxu1 %v403_v12  ;;  %v130_v18 = vld [vmem:[#allocation5 + $0xb8] sm:$0xff]  ;;  %v133_v22 = vld [vmem:[#allocation5 + $0xd0] sm:$0xff]  ;;  %v135_v25 = vld [vmem:[#allocation5 + $0xe0] sm:$0xff]  ;;  %p485_p2 = scmp.ne.s32.totalorder %s315_s6, %s484_s7  ;;  %p489_p3 = scmp.lt.s32.totalorder %s315_s6, %s315_s6 }
  0x2c   :  { %405 = vmatprep.subr.bf16.mxu1 %v516_v0  ;;  %v412_v20 = vpack.c.bf16 %v131_v19, %v130_v18  ;;  %v415_v23 = vpack.c.bf16 %v133_v22, %v132_v21  ;;  %v134_v24 = vld [vmem:[#allocation5 + $0xd8] sm:$0xff]  ;;  %v136_v27 = vld [vmem:[#allocation5 + $0xe8] sm:$0xff]  ;;  %v137_v28 = vld [vmem:[#allocation5 + $0xf0] sm:$0xff]  ;;  %p490_p4 = scmp.lt.s32.totalorder %s488_s8, %s484_s7 }
  0x2d   :  { %v418_v26 = vpack.c.bf16 %v135_v25, %v134_v24  ;;  %v421_v29 = vpack.c.bf16 %v137_v28, %v136_v27  ;;  %v138_v30 = vld [vmem:[#allocation5 + $0xf8] sm:$0xff]  ;;  %v139_v31 = vld [vmem:[#allocation5 + $0x100] sm:$0xff]  ;;  %v326_v41 = vld [vmem:[#allocation5 + $0x108] ss:$0 sm:$0xff] }
  0x2e   :  { %401 = vmatpush3.bf16.msra.mxu0 %v400_v11  ;;  %v424_v32 = vpack.c.bf16 %v139_v31, %v138_v30  ;;  %v324_v33 = vld [vmem:[#allocation5 + $0x80] ss:$0 sm:$0xff]  ;;  %v217_v42 = vld [vmem:[#allocation5 + $0x110] sm:$0xff]  ;;  %p491_p5 = por %p490_p4, %p489_p3 }
  0x2f   :  { %407 = vmatpush3.bf16.msra.mxu1 %v406_v13  ;;  %v222_v46 = vrot.slane %v217_v42, %v221_v40  ;;  %v218_v50 = vld [vmem:[#allocation5 + $0x190] sm:$0x1] }
  0x30   :  { %408 = vmatprep.subr.bf16.mxu1 %v516_v0  ;;  %p492_p6 = pnand %p491_p5, %p485_p2 }
  0x31   :  { %359 = vmatmul.mubr.msk.f32.vlgmr.msra.gmra.mrb[0].mxu0 %vm48_vm1, %v38_v16 }
  0x33   :  { %410 = vmatpush3.bf16.msra.mxu1 %v409_v17 }
  0x34   :  { %411 = vmatprep.subr.bf16.mxu1 %v516_v0 }
  0x37   :  { %413 = vmatpush3.bf16.msra.mxu1 %v412_v20 }
  0x38   :  { %414 = vmatprep.subr.bf16.mxu1 %v516_v0 }
  0x3b   :  { %416 = vmatpush3.bf16.msra.mxu1 %v415_v23 }
  0x3c   :  { %417 = vmatprep.subr.bf16.mxu1 %v516_v0 }
  0x3f   :  { %419 = vmatpush3.bf16.msra.mxu1 %v418_v26 }
  0x40   :  { %420 = vmatprep.subr.bf16.mxu1 %v516_v0 }
  0x43   :  { %422 = vmatpush3.bf16.msra.mxu1 %v421_v29 }
  0x44   :  { %423 = vmatprep.subr.bf16.mxu1 %v516_v0 }
  0x47   :  { %425 = vmatpush3.bf16.msra.mxu1 %v424_v32 }
 0x104   :  { %v118_v34 = vpop.f32.mrb[0].mxu0 }
 0x105   :  { %v119_v35 = vadd.f32 %v324_v33, %v118_v34  ;;  %v360_v36 = vpop.f32.mrb[1].mxu0 }
 0x107   :  { %v122_v37 = vmax.f32 %v119_v35, 0.0 }
 0x109   :  { %394 = vmatmul.mubr.f32.vlgmr.msra.gmra.mrb[0].mxu1 %v122_v37 }
 0x1dc   :  { %v211_v43 = vpop.f32.mrb[0].mxu1 }
 0x1dd   :  { %v212_v44 = vadd.f32 %v326_v41, %v211_v43  ;;  %v395_v45 = vpop.f32.mrb[1].mxu1 }
 0x1df   :  { %v215_v47 = vmax.f32 %v212_v44, 0.0 }
 0x1e1   :  { %v223_v48 = vmul.f32 %v222_v46, %v215_v47 }
 0x1e3   :  { %224 = vxpose.xlu0.b32.start.end [1/1] (short) %v223_v48, 128 }
 0x20c   :  { %435 = vset.pattern.permute.xlu0 %v519_v49 }
 0x248   :  { %296 = vperm.xlu0 %435, %v218_v50  }
 0x263   :  { %v240_v51 = vpop.trf.xlu0 }
 0x264   :  { %v257_v57 = vsel %vm256_vm2, %v240_v51, 0.0 }
 0x267   :  { %v241_v52 = vpop.trf.xlu0 }
 0x268   :  { %v258_v58 = vsel %vm256_vm2, %v241_v52, 0.0 }
 0x269   :  { %v259_v60 = vadd.f32 %v258_v58, %v257_v57 }
 0x26b   :  { %v242_v53 = vpop.trf.xlu0 }
 0x26c   :  { %v260_v61 = vsel %vm256_vm2, %v242_v53, 0.0 }
 0x26d   :  { %v261_v63 = vadd.f32 %v260_v61, %v259_v60 }
 0x26f   :  { %v243_v54 = vpop.trf.xlu0 }
 0x270   :  { %v262_v0 = vsel %vm256_vm2, %v243_v54, 0.0 }
 0x271   :  { %v263_v2 = vadd.f32 %v262_v0, %v261_v63 }
 0x273   :  { %v244_v55 = vpop.trf.xlu0 }
 0x274   :  { %v264_v3 = vsel %vm256_vm2, %v244_v55, 0.0 }
 0x275   :  { %v265_v5 = vadd.f32 %v264_v3, %v263_v2 }
 0x277   :  { %v245_v56 = vpop.trf.xlu0 }
 0x278   :  { %v266_v6 = vsel %vm256_vm2, %v245_v56, 0.0 }
 0x279   :  { %v267_v8 = vadd.f32 %v266_v6, %v265_v5 }
 0x27b   :  { %v246_v59 = vpop.trf.xlu0 }
 0x27c   :  { %v268_v9 = vsel %vm256_vm2, %v246_v59, 0.0 }
 0x27d   :  { %v269_v10 = vadd.f32 %v268_v9, %v267_v8 }
 0x27f   :  { %v247_v62 = vpop.trf.xlu0 }
 0x280   :  { %v270_v12 = vsel %vm256_vm2, %v247_v62, 0.0 }
 0x281   :  { %v271_v13 = vadd.f32 %v270_v12, %v269_v10 }
 0x283   :  { %v248_v1 = vpop.trf.xlu0 }
 0x284   :  { %v272_v14 = vsel %vm256_vm2, %v248_v1, 0.0 }
 0x285   :  { %v273_v16 = vadd.f32 %v272_v14, %v271_v13 }
 0x287   :  { %v249_v4 = vpop.trf.xlu0 }
 0x288   :  { %v274_v17 = vsel %vm256_vm2, %v249_v4, 0.0 }
 0x289   :  { %v275_v18 = vadd.f32 %v274_v17, %v273_v16 }
 0x28b   :  { %v250_v7 = vpop.trf.xlu0 }
 0x28c   :  { %v276_v20 = vsel %vm256_vm2, %v250_v7, 0.0 }
 0x28d   :  { %v277_v21 = vadd.f32 %v276_v20, %v275_v18 }
 0x28f   :  { %v251_v11 = vpop.trf.xlu0 }
 0x290   :  { %v278_v22 = vsel %vm256_vm2, %v251_v11, 0.0 }
 0x291   :  { %v279_v24 = vadd.f32 %v278_v22, %v277_v21 }
 0x293   :  { %v252_v15 = vpop.trf.xlu0 }
 0x294   :  { %v280_v25 = vsel %vm256_vm2, %v252_v15, 0.0 }
 0x295   :  { %v281_v27 = vadd.f32 %v280_v25, %v279_v24 }
 0x297   :  { %v253_v19 = vpop.trf.xlu0 }
 0x298   :  { %v282_v26 = vsel %vm256_vm2, %v253_v19, 0.0 }
 0x299   :  { %v283_v30 = vadd.f32 %v282_v26, %v281_v27 }
 0x29b   :  { %v254_v23 = vpop.trf.xlu0 }
 0x29c   :  { %v284_v29 = vsel %vm256_vm2, %v254_v23, 0.0 }
 0x29d   :  { %v285_v32 = vadd.f32 %v284_v29, %v283_v30 }
 0x29f   :  { %v255_v28 = vpop.trf.xlu0 }
 0x2a0   :  { %v286_v31 = vsel %vm256_vm2, %v255_v28, 0.0 }
 0x2a1   :  { %v287_v33 = vadd.f32 %v286_v31, %v285_v32 }
 0x2a3   :  { %v288_v34 = vrot.slane %v287_v33, 4 }
 0x2a5   :  { %v289_v35 = vadd.f32 %v288_v34, %v287_v33 }
 0x2a7   :  { %v290_v36 = vrot.slane %v289_v35, 2 }
 0x2a9   :  { %v291_v37 = vadd.f32 %v290_v36, %v289_v35 }
 0x2ab   :  { %v292_v38 = vrot.slane %v291_v37, 1 }
 0x2ad   :  { %v293_v39 = vadd.f32 %v292_v38, %v291_v37 }
 0x2c7   :  { %v297_v40 = vpop.permute.xlu0 %296 }
 0x2c8   :  { %v299_v41 = vadd.f32 %v297_v40, %v293_v39 }
 0x2ca   :  { %v327_v42 = vmul.f32 -1.442695, %v299_v41 }
 0x2cc   :  { %436 = vpow2.f32 %v327_v42 }
 0x2d6   :  { %v437_v43 = vpop.eup %436 }
 0x2d7   :  { %v303_v44 = vadd.f32 1.0, %v437_v43 }
 0x2d9   :  { %438 = vrcp.f32 %v303_v44 }
 0x2e3   :  { %v439_v45 = vpop.eup %438 }
 0x2e4   :  { %307 = vst.msk [vmem:[#allocation7] sm:$0x1] %vm306_vm3, %v439_v45 }
 0x2e5   :  { %495 = shalt.err (!%p492_p6)
}
 0x2e6   :  { %s496_s11 = scalar_lea.hbm %s597_s2, 16 }
 0x2e7   :  { %p497_p7 = scmp.ne.s32.totalorder %s597_s2, %s496_s11  ;;  %p500_p8 = scmp.lt.u32.totalorder %s496_s11, %s597_s2 }
 0x2e9   :  { %p502_p9 = pnand %p500_p8, %p497_p7 }
 0x2eb   :  { %505 = shalt.err (!%p502_p9)
}
 0x2ec   :  { %317 = dma.vmem_to_hbm [thread:$0]  %s315_s6, 16, %s597_s2, [#allocation4]  }
 0x2ed   :  { %510 = dma.done.wait [#allocation4], 16  }
 0x2ee   :  { %511 = vsyncadd [#allocation4], 4294967280 }
 0x2ef   :  { %321 = vsyncpa [#allocation3], 1 }
 0x2f0   :  { %322 = vsyncpa [#allocation6], 1 }
 0x2f1   :  { %323 = vsyncpa [#allocation4], 1 }

</bundles_post_ra>
